<compile_context>
chip_gen: v7x
topology: tpu7x:2x2x1
jax: 0.10.0
libtpu: 0.0.40
codegen_flags: <defaults>
</compile_context>

<pallas_src>
import functools

import jax
import jax.numpy as jnp
from jax.experimental import pallas as pl
from jax.experimental.pallas import tpu as pltpu

LANES = 128
SUBLANES = 8
MAX_TILE_M = 2048  # 2048 rows * 128 lanes * 4 B = 1 MiB per block per input.


def _round_up(x, m):
    return (x + m - 1) // m * m


def _cdiv(a, b):
    return -(-a // b)


def _sublane_granule(dtype):
    # second-to-last block-dim granularity: f32 -> 8, bf16 -> 16, int8/fp8 -> 32
    return max(SUBLANES, 32 // jnp.dtype(dtype).itemsize)


def _l1_sum_kernel(o_ref, l_ref, out_ref, acc_ref, *,
                   tile_m, blocks_per_split, valid_rows):
    p = pl.program_id(0)          # parallel split (uses both TCs on v7x)
    j = pl.program_id(1)          # reduction over row tiles

    @pl.when(j == 0)
    def _init():
        acc_ref[...] = jnp.zeros_like(acc_ref)

    # |o - l| in f32; inputs stream at native dtype, upcast in-register.
    diff = jnp.abs(o_ref[...].astype(jnp.float32)
                   - l_ref[...].astype(jnp.float32))

    # Row mask zeroes (a) the partially-filled last row tile and (b) clamped /
    # duplicated tiles of the parallel split. Pure VPU work, hidden under the
    # HBM stream.
    row0 = (p * blocks_per_split + j) * tile_m
    rows = jax.lax.broadcasted_iota(jnp.int32, (tile_m, 1), 0) + row0
    diff = jnp.where(rows < valid_rows, diff, 0.0)

    # Vreg-shaped partial sums: axis-0 reduction is plain VPU vreg adds; the
    # expensive cross-lane/sublane reduce is NOT in the hot loop.
    acc_ref[...] += diff.reshape(-1, SUBLANES, LANES).sum(axis=0)

    @pl.when(j == pl.num_programs(1) - 1)
    def _finalize():
        out_ref[0] = acc_ref[...]


def image_loss(output, label):
    """Pallas equivalent of nn.L1Loss()(output, label) (mean reduction)."""
    assert output.shape == label.shape
    n_elems = output.size

    o_flat = output.reshape(-1)
    l_flat = label.reshape(-1)

    m_rows = n_elems // LANES            # full 128-lane rows -> kernel
    rem = n_elems - m_rows * LANES       # <128 trailing elems -> plain JAX

    if m_rows == 0:  # tiny-input fallback
        return jnp.mean(jnp.abs(o_flat.astype(jnp.float32)
                                - l_flat.astype(jnp.float32)))

    tail_sum = jnp.float32(0.0)
    if rem:
        # NOTE: this path only triggers when n_elems % 128 != 0 (rare for
        # image tensors); the prefix slice may cost one copy, the tail itself
        # is <128 elements.
        tail_sum = jnp.sum(jnp.abs(
            o_flat[m_rows * LANES:].astype(jnp.float32)
            - l_flat[m_rows * LANES:].astype(jnp.float32)))
        o_flat = o_flat[: m_rows * LANES]
        l_flat = l_flat[: m_rows * LANES]

    o2 = o_flat.reshape(m_rows, LANES)   # free reshape (contiguous)
    l2 = l_flat.reshape(m_rows, LANES)

    granule = max(_sublane_granule(o2.dtype), _sublane_granule(l2.dtype))
    tile_m = min(MAX_TILE_M, _round_up(m_rows, granule))
    total_blocks = _cdiv(m_rows, tile_m)

    # Two-way parallel split of the row blocks: both TensorCores on v7x,
    # harmless sequential outer loop on single-TC v5e/v6e.
    nsplit = 2 if total_blocks >= 2 else 1
    blocks_per_split = _cdiv(total_blocks, nsplit)

    def row_block_index(p, j):
        # Clamp so over-allocated iterations re-read the last real block; their
        # contribution is zeroed by the in-kernel row mask.
        return (jnp.minimum(p * blocks_per_split + j, total_blocks - 1), 0)

    kernel = functools.partial(
        _l1_sum_kernel,
        tile_m=tile_m,
        blocks_per_split=blocks_per_split,
        valid_rows=m_rows,
    )

    partial = pl.pallas_call(
        kernel,
        out_shape=jax.ShapeDtypeStruct((nsplit, SUBLANES, LANES), jnp.float32),
        grid_spec=pltpu.PrefetchScalarGridSpec(
            num_scalar_prefetch=0,
            grid=(nsplit, blocks_per_split),
            in_specs=[
                pl.BlockSpec((tile_m, LANES), row_block_index),
                pl.BlockSpec((tile_m, LANES), row_block_index),
            ],
            out_specs=pl.BlockSpec((1, SUBLANES, LANES),
                                   lambda p, j: (p, 0, 0)),
            scratch_shapes=[pltpu.VMEM((SUBLANES, LANES), jnp.float32)],
        ),
        compiler_params=pltpu.CompilerParams(
            dimension_semantics=("parallel", "arbitrary"),
        ),
    )(o2, l2)

    # Single cheap cross-lane reduce over the tiny partial-sum slab.
    total = jnp.sum(partial) + tail_sum
    return total / jnp.float32(n_elems)


if __name__ == "__main__":
    key = jax.random.PRNGKey(0)
    k1, k2 = jax.random.split(key)
    # NCHW, small shapes: batch=2, channels=4, spatial=16x16
    output = jax.random.normal(k1, (2, 4, 16, 16), dtype=jnp.float32)
    label = jax.random.normal(k2, (2, 4, 16, 16), dtype=jnp.float32)

    loss = image_loss(output, label)
    jax.block_until_ready(loss)

    # sanity check against plain-JAX reference
    ref = jnp.mean(jnp.abs(output - label))
    assert jnp.allclose(loss, ref, rtol=1e-5, atol=1e-6), (loss, ref)

    print("KERNEL_OK")
</pallas_src>

<mosaic_0001>
module attributes {stable_mosaic.version = 11 : i64} {
  func.func @_l1_sum_kernel(%arg0: i32, %arg1: i32, %arg2: memref<16x128xf32, #tpu.memory_space<vmem>>, %arg3: memref<16x128xf32, #tpu.memory_space<vmem>>, %arg4: memref<1x8x128xf32, #tpu.memory_space<vmem>>, %arg5: memref<8x128xf32, #tpu.memory_space<vmem>>) attributes {dimension_semantics = [#tpu.dimension_semantics<parallel>, #tpu.dimension_semantics<arbitrary>], iteration_bounds = array<i64: 1, 1>, scalar_prefetch = 0 : i64, scratch_operands = 1 : i64, tpu.core_type = #tpu.core_type<tc>, window_params = [{transform_indices = @transform_0, window_bounds = array<i64: 16, 128>}, {transform_indices = @transform_1, window_bounds = array<i64: 16, 128>}, {transform_indices = @transform_2, window_bounds = array<i64: 1, 8, 128>}]} {
    %c0_i32 = arith.constant 0 : i32
    %0 = arith.cmpi eq, %arg1, %c0_i32 : i32
    %1 = arith.extui %0 : i1 to i32
    %c0_i32_0 = arith.constant 0 : i32
    %2 = arith.cmpi ne, %1, %c0_i32_0 : i32
    scf.if %2 {
      %cst_12 = arith.constant 0.000000e+00 : f32
      %27 = vector.broadcast %cst_12 : f32 to vector<8x128xf32>
      %c0_13 = arith.constant 0 : index
      %c0_14 = arith.constant 0 : index
      %28 = vector.load %arg5[%c0_13, %c0_14] : memref<8x128xf32, #tpu.memory_space<vmem>>, vector<8x128xf32>
      tpu.vector_store %arg5[%c0_13, %c0_14], %27 {strides = array<i32>} : memref<8x128xf32, #tpu.memory_space<vmem>>, vector<8x128xf32>,
    } else {
    }
    %c0 = arith.constant 0 : index
    %c0_1 = arith.constant 0 : index
    %3 = vector.load %arg2[%c0, %c0_1] : memref<16x128xf32, #tpu.memory_space<vmem>>, vector<16x128xf32>
    %c0_2 = arith.constant 0 : index
    %c0_3 = arith.constant 0 : index
    %4 = vector.load %arg3[%c0_2, %c0_3] : memref<16x128xf32, #tpu.memory_space<vmem>>, vector<16x128xf32>
    %5 = arith.subf %3, %4 : vector<16x128xf32>
    %6 = math.absf %5 : vector<16x128xf32>
    %c1_i32 = arith.constant 1 : i32
    %7 = arith.muli %arg0, %c1_i32 : i32
    %8 = arith.addi %7, %arg1 : i32
    %c16_i32 = arith.constant 16 : i32
    %9 = arith.muli %8, %c16_i32 : i32
    %10 = tpu.iota {dimensions = array<i32: 0>} : vector<16x1xi32>
    %11 = vector.broadcast %9 : i32 to vector<16x1xi32>
    %12 = arith.addi %10, %11 : vector<16x1xi32>
    %c16_i32_4 = arith.constant 16 : i32
    %13 = vector.broadcast %c16_i32_4 : i32 to vector<16x1xi32>
    %14 = arith.cmpi slt, %12, %13 : vector<16x1xi32>
    %cst = arith.constant 0.000000e+00 : f32
    %15 = vector.shape_cast %14 : vector<16x1xi1> to vector<16x1xi1>
    %16 = vector.broadcast %15 : vector<16x1xi1> to vector<16x128xi1>
    %17 = vector.broadcast %cst : f32 to vector<16x128xf32>
    %18 = arith.select %16, %6, %17 : vector<16x128xi1>, vector<16x128xf32>
    %c0_5 = arith.constant 0 : index
    %c0_6 = arith.constant 0 : index
    %19 = vector.load %arg5[%c0_5, %c0_6] : memref<8x128xf32, #tpu.memory_space<vmem>>, vector<8x128xf32>
    %20 = vector.shape_cast %18 : vector<16x128xf32> to vector<2x8x128xf32>
    %cst_7 = arith.constant dense<0.000000e+00> : vector<8x128xf32>
    %21 = vector.multi_reduction <add>, %20, %cst_7 [0] : vector<2x8x128xf32> to vector<8x128xf32>
    %22 = arith.addf %19, %21 : vector<8x128xf32>
    %c0_8 = arith.constant 0 : index
    %c0_9 = arith.constant 0 : index
    %23 = vector.load %arg5[%c0_8, %c0_9] : memref<8x128xf32, #tpu.memory_space<vmem>>, vector<8x128xf32>
    tpu.vector_store %arg5[%c0_8, %c0_9], %22 {strides = array<i32>} : memref<8x128xf32, #tpu.memory_space<vmem>>, vector<8x128xf32>,
    %c0_i32_10 = arith.constant 0 : i32
    %24 = arith.cmpi eq, %arg1, %c0_i32_10 : i32
    %25 = arith.extui %24 : i1 to i32
    %c0_i32_11 = arith.constant 0 : i32
    %26 = arith.cmpi ne, %25, %c0_i32_11 : i32
    scf.if %26 {
      %c0_12 = arith.constant 0 : index
      %c0_13 = arith.constant 0 : index
      %27 = vector.load %arg5[%c0_12, %c0_13] : memref<8x128xf32, #tpu.memory_space<vmem>>, vector<8x128xf32>
      %c0_14 = arith.constant 0 : index
      %c0_15 = arith.constant 0 : index
      %c0_16 = arith.constant 0 : index
      %28 = vector.load %arg4[%c0_14, %c0_15, %c0_16] : memref<1x8x128xf32, #tpu.memory_space<vmem>>, vector<1x8x128xf32>
      %29 = vector.shape_cast %28 : vector<1x8x128xf32> to vector<8x128xf32>
      %30 = vector.shape_cast %27 : vector<8x128xf32> to vector<1x8x128xf32>
      tpu.vector_store %arg4[%c0_14, %c0_15, %c0_16], %30 {strides = array<i32>} : memref<1x8x128xf32, #tpu.memory_space<vmem>>, vector<1x8x128xf32>,
    } else {
    }
    return
  }
  func.func @transform_0(%arg0: i32, %arg1: i32) -> (i32, i32) {
    %c1_i32 = arith.constant 1 : i32
    %0 = arith.muli %arg0, %c1_i32 : i32
    %1 = arith.addi %0, %arg1 : i32
    %c0_i32 = arith.constant 0 : i32
    %2 = arith.minsi %1, %c0_i32 : i32
    %c0_i32_0 = arith.constant 0 : i32
    %c0_i32_1 = arith.constant 0 : i32
    return %2, %c0_i32_0 : i32, i32
  }
  func.func @transform_1(%arg0: i32, %arg1: i32) -> (i32, i32) {
    %c1_i32 = arith.constant 1 : i32
    %0 = arith.muli %arg0, %c1_i32 : i32
    %1 = arith.addi %0, %arg1 : i32
    %c0_i32 = arith.constant 0 : i32
    %2 = arith.minsi %1, %c0_i32 : i32
    %c0_i32_0 = arith.constant 0 : i32
    %c0_i32_1 = arith.constant 0 : i32
    return %2, %c0_i32_0 : i32, i32
  }
  func.func @transform_2(%arg0: i32, %arg1: i32) -> (i32, i32, i32) {
    %c0_i32 = arith.constant 0 : i32
    %c0_i32_0 = arith.constant 0 : i32
    %c0_i32_1 = arith.constant 0 : i32
    return %arg0, %c0_i32, %c0_i32_0 : i32, i32, i32
  }
}

</mosaic_0001>

<bundles_post_ra>
// kernel: tpu_custom_call.1
= control target key start
LH: loop header
LB: loop body
LE: loop exit
PB: predicated region body
PF: predicated region fallthrough
CT: control target
= control target key end

     0   :  { %7 = vsyncpa [#allocation4], 0  ;;  %s251_s0 = inlined_call_operand.hbm [shape: f32[16,128], index: 0, kind: input, shape index: {}]   ;;  %s252_s1 = inlined_call_operand.hbm [shape: f32[16,128], index: 1, kind: input, shape index: {}]   ;;  %s253_s2 = inlined_call_operand.hbm [shape: f32[1,8,128], index: 2, kind: output, shape index: {}]  }
   0x1   :  { %8 = vsyncpa [#allocation7], 0 }
   0x2   :  { %9 = vsyncpa [#allocation5], 0  ;;  %s195_s9 = smov [#allocation3]   ;;  %s123_s13 = scalar_lea.hbm %s251_s0, 256 }
   0x3   :  { %s21_s10 = sshll.u32 %s195_s9, 4  ;;  %p124_p0 = scmp.ne.s32.totalorder %s251_s0, %s123_s13  ;;  %s22_s10 = int_to_ptr.vmem [resolvable:$true] %s21_s10 }
   0x4   :  { %p127_p1 = scmp.lt.u32.totalorder %s123_s13, %s251_s0 }
   0x6   :  { %p129_p2 = pnand %p127_p1, %p124_p0 }
   0x8   :  { %132 = shalt.err (!%p129_p2)
}
   0x9   :  { %s133_s18 = scalar_lea.vmem %s22_s10, 256  ;;  %p138_p4 = scmp.lt.s32.totalorder %s22_s10, %s22_s10 }
   0xa   :  { %p134_p3 = scmp.ne.s32.totalorder %s22_s10, %s133_s18  ;;  %p139_p5 = scmp.lt.s32.totalorder %s133_s18, %s133_s18 }
   0xc   :  { %p140_p6 = por %p139_p5, %p138_p4 }
   0xe   :  { %p141_p7 = pnand %p140_p6, %p134_p3 }
  0x10   :  { %144 = shalt.err (!%p141_p7)
}
  0x11   :  { %s196_s19 = smov 128   ;;  %s197_s20 = smov 8  }
  0x12   :  { %27 = dma.hbm_to_vmem [thread:$0]  %s251_s0, 256, %s22_s10, [#allocation4], %s196_s19, %s196_s19, %s197_s20  }
  0x13   :  { %s198_s23 = smov [#allocation6]   ;;  %s145_s27 = scalar_lea.hbm %s252_s1, 256 }
  0x14   :  { %s39_s24 = sshll.u32 %s198_s23, 4  ;;  %p146_p8 = scmp.ne.s32.totalorder %s252_s1, %s145_s27  ;;  %s40_s24 = int_to_ptr.vmem [resolvable:$true] %s39_s24 }
  0x15   :  { %p149_p9 = scmp.lt.u32.totalorder %s145_s27, %s252_s1 }
  0x17   :  { %p151_p10 = pnand %p149_p9, %p146_p8 }
  0x19   :  { %154 = shalt.err (!%p151_p10)
}
  0x1a   :  { %s155_s4 = scalar_lea.vmem %s40_s24, 256  ;;  %p160_p12 = scmp.lt.s32.totalorder %s40_s24, %s40_s24 }
  0x1b   :  { %p156_p11 = scmp.ne.s32.totalorder %s40_s24, %s155_s4  ;;  %p161_p13 = scmp.lt.s32.totalorder %s155_s4, %s155_s4 }
  0x1d   :  { %p162_p0 = por %p161_p13, %p160_p12 }
  0x1f   :  { %p163_p1 = pnand %p162_p0, %p156_p11 }
  0x21   :  { %166 = shalt.err (!%p163_p1)
}
  0x22   :  { %45 = dma.hbm_to_vmem [thread:$0]  %s252_s1, 256, %s40_s24, [#allocation7], %s196_s19, %s196_s19, %s197_s20  }
  0x23   :  { %189 = dma.done.wait [#allocation4], 256  }
  0x24   :  { %190 = vsyncadd [#allocation4], 4294967040 }
  0x25   :  { %191 = dma.done.wait [#allocation7], 256  }
  0x26   :  { %192 = vsyncadd [#allocation7], 4294967040  ;;  %v65_v0 = vld [vmem:[#allocation3] sm:$0xff]  ;;  %v66_v1 = vld [vmem:[#allocation3 + $0x8] sm:$0xff]  ;;  %s199_s6 = smov [#allocation8]  }
  0x27   :  { %v67_v2 = vld [vmem:[#allocation6] sm:$0xff]  ;;  %v68_v3 = vld [vmem:[#allocation6 + $0x8] sm:$0xff]  ;;  %s104_s7 = sshll.u32 %s199_s6, 4  ;;  %s105_s7 = int_to_ptr.vmem [resolvable:$true] %s104_s7 }
  0x28   :  { %v69_v4 = vsub.f32 %v65_v0, %v67_v2  ;;  %v70_v5 = vsub.f32 %v66_v1, %v68_v3  ;;  %s167_s8 = scalar_lea.vmem %s105_s7, 128  ;;  %p172_p3 = scmp.lt.s32.totalorder %s105_s7, %s105_s7 }
  0x29   :  { %p168_p2 = scmp.ne.s32.totalorder %s105_s7, %s167_s8  ;;  %p173_p4 = scmp.lt.s32.totalorder %s167_s8, %s167_s8 }
  0x2a   :  { %v71_v6 = vand.u32 2147483647, %v69_v4  ;;  %v72_v7 = vand.u32 2147483647, %v70_v5 }
  0x2b   :  { %p174_p5 = por %p173_p4, %p172_p3 }
  0x2c   :  { %v90_v8 = vadd.f32 %v72_v7, %v71_v6 }
  0x2d   :  { %p175_p6 = pnand %p174_p5, %p168_p2 }
  0x2e   :  { %97 = vst [vmem:[#allocation8] sm:$0xff] %v90_v8 }
  0x2f   :  { %178 = shalt.err (!%p175_p6)
}
  0x30   :  { %s179_s10 = scalar_lea.hbm %s253_s2, 128 }
  0x31   :  { %p180_p7 = scmp.ne.s32.totalorder %s253_s2, %s179_s10  ;;  %p183_p8 = scmp.lt.u32.totalorder %s179_s10, %s253_s2 }
  0x33   :  { %p185_p9 = pnand %p183_p8, %p180_p7 }
  0x35   :  { %188 = shalt.err (!%p185_p9)
}
  0x36   :  { %107 = dma.vmem_to_hbm [thread:$0]  %s105_s7, 128, %s253_s2, [#allocation5]  }
  0x37   :  { %193 = dma.done.wait [#allocation5], 128  }
  0x38   :  { %194 = vsyncadd [#allocation5], 4294967168 }
  0x39   :  { %111 = vsyncpa [#allocation4], 1 }
  0x3a   :  { %112 = vsyncpa [#allocation7], 1 }
  0x3b   :  { %113 = vsyncpa [#allocation5], 1 }

</bundles_post_ra>
